<compile_context>
chip_gen: v7x
topology: tpu7x:2x2x1
jax: 0.10.0
libtpu: 0.0.40
codegen_flags: <defaults>
</compile_context>

<pallas_src>
import math
import jax
import jax.numpy as jnp
from jax.experimental import pallas as pl
from jax.experimental.pallas import tpu as pltpu

# ---- model config (small, consistent with the module's __init__) ----
BATCH   = 2
SEQ     = 8
HIDDEN  = 32
HEADS   = 2
HEAD    = HIDDEN // HEADS          # attention_head_size
INNER   = HEADS * HEAD             # inner_hidden_size
FF      = 64                       # feedforward_size
EXPERTS = 2                        # num_experts
EPS     = 1e-6                     # UER LayerNorm eps

PACK_W  = 128                      # lane-dense packed output width: [ out | gate | junk ]
VEC_W   = 128                      # packed small-vector table row width

# packed weight-table lane offsets — every slice stays within a single (8,128) lane tile
OFF_QKV = 0                        # (H, 3*INNER)   lanes   0: 96
OFF_WO  = 3 * INNER                # (INNER, H)     lanes  96:128
OFF_W1  = 128                      # (H, E*FF)      lanes 128:256
OFF_GW  = 256                      # (H, E)         lanes 256:258
WMAT_W  = 384

# packed small-vector table rows
R_BQKV, R_BO, R_LN1G, R_LN1B, R_LN2G, R_LN2B, R_GB, R_B1 = range(8)
R_B2  = 8                          # rows 8 .. 8+EXPERTS-1 : expert output biases
R_EXP = 8 + EXPERTS                # rows 10.. 10+EXPERTS-1: expert 0/1 expand rows
N_VEC = 8 + 2 * EXPERTS


def _gelu_exact(x):
    # UER gelu: 0.5 * x * (1 + erf(x / sqrt(2)))
    return 0.5 * x * (1.0 + jax.lax.erf(x / jnp.sqrt(2.0).astype(x.dtype)))


def _uer_layer_norm_ref(x, gamma, beta):
    # UER LayerNorm: gamma * (x - mean) / (std + eps) + beta, std = torch.std (unbiased)
    mean = jnp.mean(x, axis=-1, keepdims=True)
    var = jnp.sum((x - mean) ** 2, axis=-1, keepdims=True) / (x.shape[-1] - 1)
    std = jnp.sqrt(var)
    return gamma * (x - mean) / (std + EPS) + beta


def transformer_layer_kernel(x_ref, mask_ref, wmat_ref, w2_ref, vec_ref, out_ref):
    B, S, H = BATCH, SEQ, HIDDEN
    BS = B * S

    x = x_ref[...]                                     # (16, 32) — already flat (wrapper)
    mask = mask_ref[...]                               # (2, 8, 8) additive mask

    # packed small vectors (one (12,128) table -> one DMA)
    bqkv   = vec_ref[R_BQKV:R_BQKV + 1, 0:3 * INNER]   # (1, 96), Q part pre-scaled
    bo     = vec_ref[R_BO:R_BO + 1, 0:H]
    ln1g   = vec_ref[R_LN1G:R_LN1G + 1, 0:H]
    ln1b   = vec_ref[R_LN1B:R_LN1B + 1, 0:H]
    ln2g   = vec_ref[R_LN2G:R_LN2G + 1, 0:H]
    ln2b   = vec_ref[R_LN2B:R_LN2B + 1, 0:H]
    gb     = vec_ref[R_GB:R_GB + 1, 0:EXPERTS]
    b1     = vec_ref[R_B1:R_B1 + 1, :]                 # (1, 128) fused expert bias 1
    b2     = vec_ref[R_B2:R_B2 + EXPERTS, 0:H]         # (2, 32)  expert bias 2 rows
    expand = vec_ref[R_EXP:R_EXP + EXPERTS, :]         # (2, 128) 0/1 expert block rows

    def layer_norm(v, gamma, beta):
        # divide -> EUP approx reciprocal (idle slot); stays well inside 1e-2 tolerance
        mean = jnp.mean(v, axis=-1, keepdims=True)
        var = jnp.sum((v - mean) ** 2, axis=-1, keepdims=True) / (v.shape[-1] - 1)
        inv = pl.reciprocal(jnp.sqrt(var) + EPS, approx=True)
        return gamma * (v - mean) * inv + beta

    # ---------------- fused Q/K/V projection (scale folded into Q columns) ----------------
    qkv = jnp.dot(x, wmat_ref[:, OFF_QKV:OFF_QKV + 3 * INNER],
                  preferred_element_type=jnp.float32) + bqkv          # (16, 96)
    qkv = qkv.reshape(B, S, 3 * INNER)                 # leading-dim split: layout-trivial

    ctx_parts = []
    for h in range(HEADS):                             # static small loop, batched over B
        qh = qkv[:, :, h * HEAD:(h + 1) * HEAD]
        kh = qkv[:, :, INNER + h * HEAD:INNER + (h + 1) * HEAD]
        vh = qkv[:, :, 2 * INNER + h * HEAD:2 * INNER + (h + 1) * HEAD]
        s = jnp.einsum('bqd,bkd->bqk', qh, kh,
                       preferred_element_type=jnp.float32) + mask
        s = s - jnp.max(s, axis=-1, keepdims=True)
        p = jnp.exp(s)
        p = p * pl.reciprocal(jnp.sum(p, axis=-1, keepdims=True), approx=True)
        ctx_parts.append(jnp.einsum('bqk,bkd->bqd', p, vh,
                                    preferred_element_type=jnp.float32))
    ctx = jnp.concatenate(ctx_parts, axis=-1).reshape(BS, INNER)      # (16, 32) == unshape()

    attn = jnp.dot(ctx, wmat_ref[:, OFF_WO:OFF_WO + H],
                   preferred_element_type=jnp.float32) + bo
    # dropout_1: identity at inference
    inter = layer_norm(attn + x, ln1g, ln1b)           # (16, 32)

    # ---------------- MoE feed-forward, fused over experts ----------------
    glog = jnp.dot(inter, wmat_ref[:, OFF_GW:OFF_GW + EXPERTS],
                   preferred_element_type=jnp.float32) + gb           # (16, 2)
    glog = glog - jnp.max(glog, axis=-1, keepdims=True)
    gp = jnp.exp(glog)
    gate = gp / jnp.sum(gp, axis=-1, keepdims=True)    # exact: gate_scores is returned

    h1 = jnp.dot(inter, wmat_ref[:, OFF_W1:OFF_W1 + EXPERTS * FF],
                 preferred_element_type=jnp.float32) + b1             # (16, 128)
    h1 = _gelu_exact(h1)
    # gate weighting commutes with the (linear) expert output layer -> exact fusion;
    # broadcast gate over each expert's 64-lane block via a tiny MXU matmul.
    h1 = h1 * jnp.dot(gate, expand, preferred_element_type=jnp.float32)
    moe = jnp.dot(h1, w2_ref[...], preferred_element_type=jnp.float32)          # (16, 32)
    moe = moe + jnp.dot(gate, b2, preferred_element_type=jnp.float32)           # + sum_e g_e b2_e

    # dropout_2: identity at inference
    output = layer_norm(moe + inter, ln2g, ln2b)       # (16, 32)

    # packed output: two static lane-subrange stores into the lane-dense (16,128) tile
    out_ref[:, 0:H] = output
    out_ref[:, H:H + EXPERTS] = gate


def transformer_layer(hidden, mask, params):
    (wq, bq, wk, bk, wv, bv, wo, bo,
     ln1g, ln1b, ln2g, ln2b, gw, gb, w1, b1, w2, b2) = params
    B, S, H = hidden.shape
    BS = B * S
    scale = 1.0 / math.sqrt(float(HEAD))               # with_scale=True

    # --- fuse / pack parameters (cheap one-off XLA ops outside the kernel) ---
    wqkv = jnp.concatenate([wq * scale, wk, wv], axis=1)               # (32, 96), Q pre-scaled
    bqkv = jnp.concatenate([bq * scale, bk, bv], axis=0)               # (96,)
    w1_all = jnp.transpose(w1, (1, 0, 2)).reshape(H, EXPERTS * FF)     # (32, 128)
    b1_all = b1.reshape(EXPERTS * FF)                                  # (128,)
    w2_all = w2.reshape(EXPERTS * FF, H)                               # (128, 32)

    # single lane-padded weight table: [ wqkv | wo | w1_all | gw | pad ]  -> (32, 384)
    wmat = jnp.concatenate(
        [wqkv, wo, w1_all, gw,
         jnp.zeros((H, WMAT_W - (OFF_GW + EXPERTS)), jnp.float32)], axis=1)
    assert wmat.shape == (H, WMAT_W)

    # expert 0/1 expand rows: expand[e, j] = 1 iff j // FF == e (for in-kernel gate broadcast)
    expand = (jnp.arange(EXPERTS * FF)[None, :] // FF
              == jnp.arange(EXPERTS)[:, None]).astype(jnp.float32)     # (2, 128)

    def row(v):
        return jnp.pad(v, (0, VEC_W - v.shape[0]))
    vec = jnp.stack([row(bqkv), row(bo), row(ln1g), row(ln1b),
                     row(ln2g), row(ln2b), row(gb), row(b1_all)]
                    + [row(b2[e]) for e in range(EXPERTS)]
                    + [expand[e] for e in range(EXPERTS)], axis=0)      # (12, 128)
    assert vec.shape == (N_VEC, VEC_W)

    hidden2d = hidden.reshape(BS, H)                   # metadata-only reshape, outside kernel
    mask3d = mask[:, 0]                                # (B, S, S): squeeze the size-1 head dim

    inputs = (hidden2d, mask3d, wmat, w2_all, vec)     # 5 input DMAs + 1 output DMA

    def _full_spec(shape):
        n = len(shape)
        return pl.BlockSpec(shape, lambda i, _n=n: (0,) * _n)

    packed = pl.pallas_call(
        transformer_layer_kernel,
        out_shape=jax.ShapeDtypeStruct((BS, PACK_W), jnp.float32),
        grid_spec=pltpu.PrefetchScalarGridSpec(
            num_scalar_prefetch=0,
            grid=(1,),                                  # single step: whole batch in one shot
            in_specs=[_full_spec(a.shape) for a in inputs],
            out_specs=_full_spec((BS, PACK_W)),
        ),
        compiler_params=pltpu.CompilerParams(dimension_semantics=("arbitrary",)),
        cost_estimate=pl.CostEstimate(flops=420_000, transcendentals=2_500,
                                      bytes_accessed=70_000),
    )(*inputs)

    out = packed[:, :H].reshape(B, S, H)
    gate_scores = packed[:, H:H + EXPERTS].reshape(B, S, EXPERTS)
    return out, gate_scores


def transformer_layer_ref(hidden, mask, params):
    """Pure-JAX reference replicating the PyTorch module (per-head / per-expert loops)."""
    (wq, bq, wk, bk, wv, bv, wo, bo,
     ln1g, ln1b, ln2g, ln2b, gw, gb, w1, b1, w2, b2) = params
    x = hidden
    q = x @ wq + bq
    k = x @ wk + bk
    v = x @ wv + bv
    m = mask[:, 0]
    scale = 1.0 / math.sqrt(float(HEAD))
    ctx_parts = []
    for h in range(HEADS):
        qh = q[..., h * HEAD:(h + 1) * HEAD]
        kh = k[..., h * HEAD:(h + 1) * HEAD]
        vh = v[..., h * HEAD:(h + 1) * HEAD]
        s = jnp.einsum('bqd,bkd->bqk', qh, kh) * scale + m
        p = jax.nn.softmax(s, axis=-1)
        ctx_parts.append(jnp.einsum('bqk,bkd->bqd', p, vh))
    ctx = jnp.concatenate(ctx_parts, axis=-1)
    attn = ctx @ wo + bo
    inter = _uer_layer_norm_ref(attn + x, ln1g, ln1b)
    gate = jax.nn.softmax(inter @ gw + gb, axis=-1)
    moe = jnp.zeros_like(inter)
    for e in range(EXPERTS):
        ye = _gelu_exact(inter @ w1[e] + b1[e]) @ w2[e] + b2[e]
        moe = moe + gate[..., e:e + 1] * ye
    out = _uer_layer_norm_ref(moe + inter, ln2g, ln2b)
    return out, gate


def make_params(key):
    keys = jax.random.split(key, 8)
    scale = 0.02

    def nrm(k, shape):
        return (scale * jax.random.normal(k, shape)).astype(jnp.float32)

    wq = nrm(keys[0], (HIDDEN, INNER)); bq = jnp.zeros((INNER,), jnp.float32)
    wk = nrm(keys[1], (HIDDEN, INNER)); bk = jnp.zeros((INNER,), jnp.float32)
    wv = nrm(keys[2], (HIDDEN, INNER)); bv = jnp.zeros((INNER,), jnp.float32)
    wo = nrm(keys[3], (INNER, HIDDEN)); bo = jnp.zeros((HIDDEN,), jnp.float32)
    ln1g = jnp.ones((HIDDEN,), jnp.float32); ln1b = jnp.zeros((HIDDEN,), jnp.float32)
    ln2g = jnp.ones((HIDDEN,), jnp.float32); ln2b = jnp.zeros((HIDDEN,), jnp.float32)
    gw = nrm(keys[4], (HIDDEN, EXPERTS)); gb = jnp.zeros((EXPERTS,), jnp.float32)
    w1 = nrm(keys[5], (EXPERTS, HIDDEN, FF)); b1 = jnp.zeros((EXPERTS, FF), jnp.float32)
    w2 = nrm(keys[6], (EXPERTS, FF, HIDDEN)); b2 = jnp.zeros((EXPERTS, HIDDEN), jnp.float32)
    return [wq, bq, wk, bk, wv, bv, wo, bo,
            ln1g, ln1b, ln2g, ln2b,
            gw, gb, w1, b1, w2, b2]


if __name__ == "__main__":
    key = jax.random.PRNGKey(0)
    k_hidden, k_param = jax.random.split(key)

    hidden = jax.random.normal(k_hidden, (BATCH, SEQ, HIDDEN), jnp.float32)

    # additive attention mask: causal, 0 = visible, -10000 = masked (UER convention)
    causal = jnp.tril(jnp.ones((SEQ, SEQ), jnp.float32))
    mask = jnp.broadcast_to(((1.0 - causal) * -10000.0)[None, None],
                            (BATCH, 1, SEQ, SEQ)).astype(jnp.float32)

    params = make_params(k_param)

    out, gate_scores = transformer_layer(hidden, mask, params)
    out, gate_scores = jax.block_until_ready((out, gate_scores))

    assert out.shape == (BATCH, SEQ, HIDDEN)
    assert gate_scores.shape == (BATCH, SEQ, EXPERTS)
    assert bool(jnp.all(jnp.isfinite(out)))
    assert bool(jnp.all(jnp.isfinite(gate_scores)))

    # parity check vs. plain-JAX reference (loose tol: approx reciprocals ~1e-3 relative)
    out_ref, gate_ref = transformer_layer_ref(hidden, mask, params)
    assert float(jnp.max(jnp.abs(out - out_ref))) < 1e-2
    assert float(jnp.max(jnp.abs(gate_scores - gate_ref))) < 1e-2

    print("KERNEL_OK")
</pallas_src>

<mosaic_0001>
module attributes {stable_mosaic.version = 11 : i64} {
  func.func @transformer_layer_kernel(%arg0: i32, %arg1: memref<16x32xf32, #tpu.memory_space<vmem>>, %arg2: memref<2x8x8xf32, #tpu.memory_space<vmem>>, %arg3: memref<32x384xf32, #tpu.memory_space<vmem>>, %arg4: memref<128x32xf32, #tpu.memory_space<vmem>>, %arg5: memref<12x128xf32, #tpu.memory_space<vmem>>, %arg6: memref<16x128xf32, #tpu.memory_space<vmem>>) attributes {dimension_semantics = [#tpu.dimension_semantics<arbitrary>], iteration_bounds = array<i64: 1>, scalar_prefetch = 0 : i64, scratch_operands = 0 : i64, tpu.core_type = #tpu.core_type<tc>, window_params = [{pipeline_mode = #tpu.pipeline_mode<synchronous>, transform_indices = @transform_0, window_bounds = array<i64: 16, 32>}, {pipeline_mode = #tpu.pipeline_mode<synchronous>, transform_indices = @transform_1, window_bounds = array<i64: 2, 8, 8>}, {pipeline_mode = #tpu.pipeline_mode<synchronous>, transform_indices = @transform_2, window_bounds = array<i64: 32, 384>}, {pipeline_mode = #tpu.pipeline_mode<synchronous>, transform_indices = @transform_3, window_bounds = array<i64: 128, 32>}, {pipeline_mode = #tpu.pipeline_mode<synchronous>, transform_indices = @transform_4, window_bounds = array<i64: 12, 128>}, {pipeline_mode = #tpu.pipeline_mode<synchronous>, transform_indices = @transform_5, window_bounds = array<i64: 16, 128>}]} {
    %c0 = arith.constant 0 : index
    %c0_0 = arith.constant 0 : index
    %0 = vector.load %arg1[%c0, %c0_0] : memref<16x32xf32, #tpu.memory_space<vmem>>, vector<16x32xf32>
    %c0_1 = arith.constant 0 : index
    %c0_2 = arith.constant 0 : index
    %c0_3 = arith.constant 0 : index
    %1 = vector.load %arg2[%c0_1, %c0_2, %c0_3] : memref<2x8x8xf32, #tpu.memory_space<vmem>>, vector<2x8x8xf32>
    %c0_4 = arith.constant 0 : index
    %c0_5 = arith.constant 0 : index
    %2 = vector.load %arg5[%c0_4, %c0_5] : memref<12x128xf32, #tpu.memory_space<vmem>>, vector<1x96xf32>
    %c1 = arith.constant 1 : index
    %c0_6 = arith.constant 0 : index
    %3 = vector.load %arg5[%c1, %c0_6] : memref<12x128xf32, #tpu.memory_space<vmem>>, vector<1x32xf32>
    %c2 = arith.constant 2 : index
    %c0_7 = arith.constant 0 : index
    %4 = vector.load %arg5[%c2, %c0_7] : memref<12x128xf32, #tpu.memory_space<vmem>>, vector<1x32xf32>
    %c3 = arith.constant 3 : index
    %c0_8 = arith.constant 0 : index
    %5 = vector.load %arg5[%c3, %c0_8] : memref<12x128xf32, #tpu.memory_space<vmem>>, vector<1x32xf32>
    %c4 = arith.constant 4 : index
    %c0_9 = arith.constant 0 : index
    %6 = vector.load %arg5[%c4, %c0_9] : memref<12x128xf32, #tpu.memory_space<vmem>>, vector<1x32xf32>
    %c5 = arith.constant 5 : index
    %c0_10 = arith.constant 0 : index
    %7 = vector.load %arg5[%c5, %c0_10] : memref<12x128xf32, #tpu.memory_space<vmem>>, vector<1x32xf32>
    %c6 = arith.constant 6 : index
    %c0_11 = arith.constant 0 : index
    %8 = vector.load %arg5[%c6, %c0_11] : memref<12x128xf32, #tpu.memory_space<vmem>>, vector<1x2xf32>
    %c7 = arith.constant 7 : index
    %c0_12 = arith.constant 0 : index
    %9 = vector.load %arg5[%c7, %c0_12] : memref<12x128xf32, #tpu.memory_space<vmem>>, vector<1x128xf32>
    %c8 = arith.constant 8 : index
    %c0_13 = arith.constant 0 : index
    %10 = vector.load %arg5[%c8, %c0_13] : memref<12x128xf32, #tpu.memory_space<vmem>>, vector<2x32xf32>
    %c10 = arith.constant 10 : index
    %c0_14 = arith.constant 0 : index
    %11 = vector.load %arg5[%c10, %c0_14] : memref<12x128xf32, #tpu.memory_space<vmem>>, vector<2x128xf32>
    %c0_15 = arith.constant 0 : index
    %c0_16 = arith.constant 0 : index
    %12 = vector.load %arg3[%c0_15, %c0_16] : memref<32x384xf32, #tpu.memory_space<vmem>>, vector<32x96xf32>
    %cst = arith.constant dense<0.000000e+00> : vector<16x96xf32>
    %13 = tpu.matmul %0, %12, %cst {dimension_numbers = #tpu.dot_dimension_numbers<[1], [0], [0], [1], [0, 0, 1, 1], [], []>} : vector<16x32xf32>, vector<32x96xf32>, vector<16x96xf32> -> vector<16x96xf32>
    %14 = vector.broadcast %2 : vector<1x96xf32> to vector<16x96xf32>
    %15 = arith.addf %13, %14 : vector<16x96xf32>
    %16 = vector.shape_cast %15 : vector<16x96xf32> to vector<2x8x96xf32>
    %17 = vector.extract_strided_slice %16 {offsets = [0, 0, 0], sizes = [2, 8, 16], strides = [1, 1, 1]} : vector<2x8x96xf32> to vector<2x8x16xf32>
    %18 = vector.extract_strided_slice %16 {offsets = [0, 0, 32], sizes = [2, 8, 16], strides = [1, 1, 1]} : vector<2x8x96xf32> to vector<2x8x16xf32>
    %19 = vector.extract_strided_slice %16 {offsets = [0, 0, 64], sizes = [2, 8, 16], strides = [1, 1, 1]} : vector<2x8x96xf32> to vector<2x8x16xf32>
    "tpu.trace_start"() <{level = 10 : i32, message = "bqd,bkd->bqk"}> : () -> ()
    %cst_17 = arith.constant dense<0.000000e+00> : vector<2x8x8xf32>
    %20 = tpu.matmul %17, %18, %cst_17 {dimension_numbers = #tpu.dot_dimension_numbers<[2], [2], [1], [1], [0, 0, 0, 1, 1, 1], [0], [0]>} : vector<2x8x16xf32>, vector<2x8x16xf32>, vector<2x8x8xf32> -> vector<2x8x8xf32>
    "tpu.trace_stop"() : () -> ()
    %21 = arith.addf %20, %1 : vector<2x8x8xf32>
    %cst_18 = arith.constant dense<0xFF800000> : vector<2x8xf32>
    %22 = vector.multi_reduction <maximumf>, %21, %cst_18 [2] : vector<2x8x8xf32> to vector<2x8xf32>
    %23 = vector.shape_cast %22 : vector<2x8xf32> to vector<2x8x1xf32>
    %24 = vector.broadcast %23 : vector<2x8x1xf32> to vector<2x8x8xf32>
    %25 = arith.subf %21, %24 : vector<2x8x8xf32>
    %26 = math.exp %25 : vector<2x8x8xf32>
    %cst_19 = arith.constant dense<0.000000e+00> : vector<2x8xf32>
    %27 = vector.multi_reduction <add>, %26, %cst_19 [2] : vector<2x8x8xf32> to vector<2x8xf32>
    %28 = vector.shape_cast %27 : vector<2x8xf32> to vector<2x8x1xf32>
    %29 = tpu.reciprocal %28 {approx = true} : vector<2x8x1xf32> -> vector<2x8x1xf32>
    %30 = vector.broadcast %29 : vector<2x8x1xf32> to vector<2x8x8xf32>
    %31 = arith.mulf %26, %30 : vector<2x8x8xf32>
    "tpu.trace_start"() <{level = 10 : i32, message = "bqk,bkd->bqd"}> : () -> ()
    %cst_20 = arith.constant dense<0.000000e+00> : vector<2x8x16xf32>
    %32 = tpu.matmul %31, %19, %cst_20 {dimension_numbers = #tpu.dot_dimension_numbers<[2], [1], [1], [2], [0, 0, 0, 1, 1, 2], [0], [0]>} : vector<2x8x8xf32>, vector<2x8x16xf32>, vector<2x8x16xf32> -> vector<2x8x16xf32>
    "tpu.trace_stop"() : () -> ()
    %33 = vector.extract_strided_slice %16 {offsets = [0, 0, 16], sizes = [2, 8, 16], strides = [1, 1, 1]} : vector<2x8x96xf32> to vector<2x8x16xf32>
    %34 = vector.extract_strided_slice %16 {offsets = [0, 0, 48], sizes = [2, 8, 16], strides = [1, 1, 1]} : vector<2x8x96xf32> to vector<2x8x16xf32>
    %35 = vector.extract_strided_slice %16 {offsets = [0, 0, 80], sizes = [2, 8, 16], strides = [1, 1, 1]} : vector<2x8x96xf32> to vector<2x8x16xf32>
    "tpu.trace_start"() <{level = 10 : i32, message = "bqd,bkd->bqk"}> : () -> ()
    %cst_21 = arith.constant dense<0.000000e+00> : vector<2x8x8xf32>
    %36 = tpu.matmul %33, %34, %cst_21 {dimension_numbers = #tpu.dot_dimension_numbers<[2], [2], [1], [1], [0, 0, 0, 1, 1, 1], [0], [0]>} : vector<2x8x16xf32>, vector<2x8x16xf32>, vector<2x8x8xf32> -> vector<2x8x8xf32>
    "tpu.trace_stop"() : () -> ()
    %37 = arith.addf %36, %1 : vector<2x8x8xf32>
    %cst_22 = arith.constant dense<0xFF800000> : vector<2x8xf32>
    %38 = vector.multi_reduction <maximumf>, %37, %cst_22 [2] : vector<2x8x8xf32> to vector<2x8xf32>
    %39 = vector.shape_cast %38 : vector<2x8xf32> to vector<2x8x1xf32>
    %40 = vector.broadcast %39 : vector<2x8x1xf32> to vector<2x8x8xf32>
    %41 = arith.subf %37, %40 : vector<2x8x8xf32>
    %42 = math.exp %41 : vector<2x8x8xf32>
    %cst_23 = arith.constant dense<0.000000e+00> : vector<2x8xf32>
    %43 = vector.multi_reduction <add>, %42, %cst_23 [2] : vector<2x8x8xf32> to vector<2x8xf32>
    %44 = vector.shape_cast %43 : vector<2x8xf32> to vector<2x8x1xf32>
    %45 = tpu.reciprocal %44 {approx = true} : vector<2x8x1xf32> -> vector<2x8x1xf32>
    %46 = vector.broadcast %45 : vector<2x8x1xf32> to vector<2x8x8xf32>
    %47 = arith.mulf %42, %46 : vector<2x8x8xf32>
    "tpu.trace_start"() <{level = 10 : i32, message = "bqk,bkd->bqd"}> : () -> ()
    %cst_24 = arith.constant dense<0.000000e+00> : vector<2x8x16xf32>
    %48 = tpu.matmul %47, %35, %cst_24 {dimension_numbers = #tpu.dot_dimension_numbers<[2], [1], [1], [2], [0, 0, 0, 1, 1, 2], [0], [0]>} : vector<2x8x8xf32>, vector<2x8x16xf32>, vector<2x8x16xf32> -> vector<2x8x16xf32>
    "tpu.trace_stop"() : () -> ()
    %49 = tpu.concatenate %32, %48 in 2 : vector<2x8x16xf32>, vector<2x8x16xf32> -> vector<2x8x32xf32>
    %50 = vector.shape_cast %49 : vector<2x8x32xf32> to vector<16x32xf32>
    %c0_25 = arith.constant 0 : index
    %c96 = arith.constant 96 : index
    %51 = vector.load %arg3[%c0_25, %c96] : memref<32x384xf32, #tpu.memory_space<vmem>>, vector<32x32xf32>
    %cst_26 = arith.constant dense<0.000000e+00> : vector<16x32xf32>
    %52 = tpu.matmul %50, %51, %cst_26 {dimension_numbers = #tpu.dot_dimension_numbers<[1], [0], [0], [1], [0, 0, 1, 1], [], []>} : vector<16x32xf32>, vector<32x32xf32>, vector<16x32xf32> -> vector<16x32xf32>
    %53 = vector.broadcast %3 : vector<1x32xf32> to vector<16x32xf32>
    %54 = arith.addf %52, %53 : vector<16x32xf32>
    %55 = arith.addf %54, %0 : vector<16x32xf32>
    %cst_27 = arith.constant dense<0.000000e+00> : vector<16xf32>
    %56 = vector.multi_reduction <add>, %55, %cst_27 [1] : vector<16x32xf32> to vector<16xf32>
    %57 = vector.shape_cast %56 : vector<16xf32> to vector<16x1xf32>
    %cst_28 = arith.constant 3.200000e+01 : f32
    %58 = vector.broadcast %cst_28 : f32 to vector<16x1xf32>
    %59 = arith.divf %57, %58 : vector<16x1xf32>
    %60 = vector.broadcast %59 : vector<16x1xf32> to vector<16x32xf32>
    %61 = arith.subf %55, %60 : vector<16x32xf32>
    %62 = arith.mulf %61, %61 : vector<16x32xf32>
    %cst_29 = arith.constant dense<0.000000e+00> : vector<16xf32>
    %63 = vector.multi_reduction <add>, %62, %cst_29 [1] : vector<16x32xf32> to vector<16xf32>
    %64 = vector.shape_cast %63 : vector<16xf32> to vector<16x1xf32>
    %cst_30 = arith.constant 3.100000e+01 : f32
    %65 = vector.broadcast %cst_30 : f32 to vector<16x1xf32>
    %66 = arith.divf %64, %65 : vector<16x1xf32>
    %67 = math.sqrt %66 : vector<16x1xf32>
    %cst_31 = arith.constant 9.99999997E-7 : f32
    %68 = vector.broadcast %cst_31 : f32 to vector<16x1xf32>
    %69 = arith.addf %67, %68 : vector<16x1xf32>
    %70 = tpu.reciprocal %69 {approx = true} : vector<16x1xf32> -> vector<16x1xf32>
    %71 = vector.broadcast %59 : vector<16x1xf32> to vector<16x32xf32>
    %72 = arith.subf %55, %71 : vector<16x32xf32>
    %73 = vector.broadcast %4 : vector<1x32xf32> to vector<16x32xf32>
    %74 = arith.mulf %73, %72 : vector<16x32xf32>
    %75 = vector.broadcast %70 : vector<16x1xf32> to vector<16x32xf32>
    %76 = arith.mulf %74, %75 : vector<16x32xf32>
    %77 = vector.broadcast %5 : vector<1x32xf32> to vector<16x32xf32>
    %78 = arith.addf %76, %77 : vector<16x32xf32>
    %c0_32 = arith.constant 0 : index
    %c256 = arith.constant 256 : index
    %79 = vector.load %arg3[%c0_32, %c256] : memref<32x384xf32, #tpu.memory_space<vmem>>, vector<32x2xf32>
    %cst_33 = arith.constant dense<0.000000e+00> : vector<16x2xf32>
    %80 = tpu.matmul %78, %79, %cst_33 {dimension_numbers = #tpu.dot_dimension_numbers<[1], [0], [0], [1], [0, 0, 1, 1], [], []>} : vector<16x32xf32>, vector<32x2xf32>, vector<16x2xf32> -> vector<16x2xf32>
    %81 = vector.broadcast %8 : vector<1x2xf32> to vector<16x2xf32>
    %82 = arith.addf %80, %81 : vector<16x2xf32>
    %cst_34 = arith.constant dense<0xFF800000> : vector<16xf32>
    %83 = vector.multi_reduction <maximumf>, %82, %cst_34 [1] : vector<16x2xf32> to vector<16xf32>
    %84 = vector.shape_cast %83 : vector<16xf32> to vector<16x1xf32>
    %85 = vector.broadcast %84 : vector<16x1xf32> to vector<16x2xf32>
    %86 = arith.subf %82, %85 : vector<16x2xf32>
    %87 = math.exp %86 : vector<16x2xf32>
    %cst_35 = arith.constant dense<0.000000e+00> : vector<16xf32>
    %88 = vector.multi_reduction <add>, %87, %cst_35 [1] : vector<16x2xf32> to vector<16xf32>
    %89 = vector.shape_cast %88 : vector<16xf32> to vector<16x1xf32>
    %90 = vector.broadcast %89 : vector<16x1xf32> to vector<16x2xf32>
    %91 = arith.divf %87, %90 : vector<16x2xf32>
    %c0_36 = arith.constant 0 : index
    %c128 = arith.constant 128 : index
    %92 = vector.load %arg3[%c0_36, %c128] : memref<32x384xf32, #tpu.memory_space<vmem>>, vector<32x128xf32>
    %cst_37 = arith.constant dense<0.000000e+00> : vector<16x128xf32>
    %93 = tpu.matmul %78, %92, %cst_37 {dimension_numbers = #tpu.dot_dimension_numbers<[1], [0], [0], [1], [0, 0, 1, 1], [], []>} : vector<16x32xf32>, vector<32x128xf32>, vector<16x128xf32> -> vector<16x128xf32>
    %94 = vector.broadcast %9 : vector<1x128xf32> to vector<16x128xf32>
    %95 = arith.addf %93, %94 : vector<16x128xf32>
    %cst_38 = arith.constant 5.000000e-01 : f32
    %96 = vector.broadcast %cst_38 : f32 to vector<16x128xf32>
    %97 = arith.mulf %96, %95 : vector<16x128xf32>
    %cst_39 = arith.constant 2.000000e+00 : f32
    %98 = math.sqrt %cst_39 : f32
    %99 = vector.broadcast %98 : f32 to vector<16x128xf32>
    %100 = arith.divf %95, %99 : vector<16x128xf32>
    %101 = math.erf %100 : vector<16x128xf32>
    %cst_40 = arith.constant 1.000000e+00 : f32
    %102 = vector.broadcast %cst_40 : f32 to vector<16x128xf32>
    %103 = arith.addf %102, %101 : vector<16x128xf32>
    %104 = arith.mulf %97, %103 : vector<16x128xf32>
    %cst_41 = arith.constant dense<0.000000e+00> : vector<16x128xf32>
    %105 = tpu.matmul %91, %11, %cst_41 {dimension_numbers = #tpu.dot_dimension_numbers<[1], [0], [0], [1], [0, 0, 1, 1], [], []>} : vector<16x2xf32>, vector<2x128xf32>, vector<16x128xf32> -> vector<16x128xf32>
    %106 = arith.mulf %104, %105 : vector<16x128xf32>
    %c0_42 = arith.constant 0 : index
    %c0_43 = arith.constant 0 : index
    %107 = vector.load %arg4[%c0_42, %c0_43] : memref<128x32xf32, #tpu.memory_space<vmem>>, vector<128x32xf32>
    %cst_44 = arith.constant dense<0.000000e+00> : vector<16x32xf32>
    %108 = tpu.matmul %106, %107, %cst_44 {dimension_numbers = #tpu.dot_dimension_numbers<[1], [0], [0], [1], [0, 0, 1, 1], [], []>} : vector<16x128xf32>, vector<128x32xf32>, vector<16x32xf32> -> vector<16x32xf32>
    %cst_45 = arith.constant dense<0.000000e+00> : vector<16x32xf32>
    %109 = tpu.matmul %91, %10, %cst_45 {dimension_numbers = #tpu.dot_dimension_numbers<[1], [0], [0], [1], [0, 0, 1, 1], [], []>} : vector<16x2xf32>, vector<2x32xf32>, vector<16x32xf32> -> vector<16x32xf32>
    %110 = arith.addf %108, %109 : vector<16x32xf32>
    %111 = arith.addf %110, %78 : vector<16x32xf32>
    %cst_46 = arith.constant dense<0.000000e+00> : vector<16xf32>
    %112 = vector.multi_reduction <add>, %111, %cst_46 [1] : vector<16x32xf32> to vector<16xf32>
    %113 = vector.shape_cast %112 : vector<16xf32> to vector<16x1xf32>
    %cst_47 = arith.constant 3.200000e+01 : f32
    %114 = vector.broadcast %cst_47 : f32 to vector<16x1xf32>
    %115 = arith.divf %113, %114 : vector<16x1xf32>
    %116 = vector.broadcast %115 : vector<16x1xf32> to vector<16x32xf32>
    %117 = arith.subf %111, %116 : vector<16x32xf32>
    %118 = arith.mulf %117, %117 : vector<16x32xf32>
    %cst_48 = arith.constant dense<0.000000e+00> : vector<16xf32>
    %119 = vector.multi_reduction <add>, %118, %cst_48 [1] : vector<16x32xf32> to vector<16xf32>
    %120 = vector.shape_cast %119 : vector<16xf32> to vector<16x1xf32>
    %cst_49 = arith.constant 3.100000e+01 : f32
    %121 = vector.broadcast %cst_49 : f32 to vector<16x1xf32>
    %122 = arith.divf %120, %121 : vector<16x1xf32>
    %123 = math.sqrt %122 : vector<16x1xf32>
    %cst_50 = arith.constant 9.99999997E-7 : f32
    %124 = vector.broadcast %cst_50 : f32 to vector<16x1xf32>
    %125 = arith.addf %123, %124 : vector<16x1xf32>
    %126 = tpu.reciprocal %125 {approx = true} : vector<16x1xf32> -> vector<16x1xf32>
    %127 = vector.broadcast %115 : vector<16x1xf32> to vector<16x32xf32>
    %128 = arith.subf %111, %127 : vector<16x32xf32>
    %129 = vector.broadcast %6 : vector<1x32xf32> to vector<16x32xf32>
    %130 = arith.mulf %129, %128 : vector<16x32xf32>
    %131 = vector.broadcast %126 : vector<16x1xf32> to vector<16x32xf32>
    %132 = arith.mulf %130, %131 : vector<16x32xf32>
    %133 = vector.broadcast %7 : vector<1x32xf32> to vector<16x32xf32>
    %134 = arith.addf %132, %133 : vector<16x32xf32>
    %c0_51 = arith.constant 0 : index
    %c0_52 = arith.constant 0 : index
    %135 = vector.load %arg6[%c0_51, %c0_52] : memref<16x128xf32, #tpu.memory_space<vmem>>, vector<16x32xf32>
    tpu.vector_store %arg6[%c0_51, %c0_52], %134 {strides = array<i32>} : memref<16x128xf32, #tpu.memory_space<vmem>>, vector<16x32xf32>,
    %c0_53 = arith.constant 0 : index
    %c32 = arith.constant 32 : index
    %136 = vector.load %arg6[%c0_53, %c32] : memref<16x128xf32, #tpu.memory_space<vmem>>, vector<16x2xf32>
    tpu.vector_store %arg6[%c0_53, %c32], %91 {strides = array<i32>} : memref<16x128xf32, #tpu.memory_space<vmem>>, vector<16x2xf32>,
    return
  }
  func.func @transform_0(%arg0: i32) -> (i32, i32) {
    %c0_i32 = arith.constant 0 : i32
    %c0_i32_0 = arith.constant 0 : i32
    %c0_i32_1 = arith.constant 0 : i32
    return %c0_i32, %c0_i32_0 : i32, i32
  }
  func.func @transform_1(%arg0: i32) -> (i32, i32, i32) {
    %c0_i32 = arith.constant 0 : i32
    %c0_i32_0 = arith.constant 0 : i32
    %c0_i32_1 = arith.constant 0 : i32
    %c0_i32_2 = arith.constant 0 : i32
    return %c0_i32, %c0_i32_0, %c0_i32_1 : i32, i32, i32
  }
  func.func @transform_2(%arg0: i32) -> (i32, i32) {
    %c0_i32 = arith.constant 0 : i32
    %c0_i32_0 = arith.constant 0 : i32
    %c0_i32_1 = arith.constant 0 : i32
    return %c0_i32, %c0_i32_0 : i32, i32
  }
  func.func @transform_3(%arg0: i32) -> (i32, i32) {
    %c0_i32 = arith.constant 0 : i32
    %c0_i32_0 = arith.constant 0 : i32
    %c0_i32_1 = arith.constant 0 : i32
    return %c0_i32, %c0_i32_0 : i32, i32
  }
  func.func @transform_4(%arg0: i32) -> (i32, i32) {
    %c0_i32 = arith.constant 0 : i32
    %c0_i32_0 = arith.constant 0 : i32
    %c0_i32_1 = arith.constant 0 : i32
    return %c0_i32, %c0_i32_0 : i32, i32
  }
  func.func @transform_5(%arg0: i32) -> (i32, i32) {
    %c0_i32 = arith.constant 0 : i32
    %c0_i32_0 = arith.constant 0 : i32
    %c0_i32_1 = arith.constant 0 : i32
    return %c0_i32, %c0_i32_0 : i32, i32
  }
}

</mosaic_0001>

<bundles_post_ra>
// kernel: tpu_custom_call.1
= control target key start
LH: loop header
LB: loop body
LE: loop exit
PB: predicated region body
PF: predicated region fallthrough
CT: control target
= control target key end

     0   :  { %vm43_vm0 = vcmask 261120   ;;  %s2222_s0 = inlined_call_operand.vmem [shape: f32[16,32], index: 0, kind: input, shape index: {}]   ;;  %s2223_s1 = inlined_call_operand.vmem [shape: f32[2,8,8], index: 1, kind: input, shape index: {}]   ;;  %s2224_s2 = inlined_call_operand.vmem [shape: f32[32,384], index: 2, kind: input, shape index: {}]   ;;  %s2225_s3 = inlined_call_operand.vmem [shape: f32[128,32], index: 3, kind: input, shape index: {}]   ;;  %s2226_s4 = inlined_call_operand.vmem [shape: f32[12,128], index: 4, kind: input, shape index: {}]   ;;  %s2227_s5 = inlined_call_operand.hbm [shape: f32[16,128], index: 5, kind: output, shape index: {}]  }
   0x1   :  { %v1927_v0 = vld [vmem:[%s2224_s2] sm:$0xff]  ;;  %v1932_v1 = vld [vmem:[%s2224_s2 + $0x18] sm:$0xff]  ;;  %v1937_v2 = vld [vmem:[%s2224_s2 + $0x30] sm:$0xff] }
   0x2   :  { %v1726_v3 = vpack.c.bf16 %v1932_v1, %v1927_v0  ;;  %v1944_v4 = vld [vmem:[%s2224_s2 + $0x48] sm:$0xff]  ;;  %v1949_v5 = vld [vmem:[%s2222_s0] sm:$0xff] }
   0x3   :  { %v1730_v6 = vpack.c.bf16 %v1944_v4, %v1937_v2  ;;  %1605 = vmatprep.mubr.msk.f32.mxu0 %vm43_vm0, %v1949_v5 }
   0x4   :  { %10 = vsyncpa [#allocation3], 0  ;;  %1727 = vmatprep.subr.bf16.mxu0 %v1726_v3  ;;  %v1958_v7 = vld [vmem:[%s2222_s0 + $0x8] sm:$0xff]  ;;  %v1882_v8 = vmov 0.0   ;;  %vm1883_vm1 = vmmov 0   ;;  %s1884_s0 = smov 96  }
   0x5   :  { %1729 = vmatpush3.bf16.msra.mxu0 %v1726_v3  ;;  %1623 = vmatprep.subr.mxu1 %v1882_v8  ;;  %v1499_v9 = vld [vmem:[%s2226_s4] ss:$0 sm:$0xff]  ;;  %vm128_vm2 = vcmask 130048   ;;  %vm280_vm3 = vcmask 64512   ;;  %v1998_v20 = vld [vmem:[%s2223_s1 + $0x8] sm:$0xff]  ;;  %s1885_s11 = smov 64  }
   0x6   :  { %1731 = vmatprep.subr.bf16.mxu0 %v1730_v6  ;;  %1625 = vmatprep.mubr.msk.f32.mxu1 %vm1883_vm1, %v1882_v8  ;;  %v1992_v16 = vld [vmem:[%s2223_s1] sm:$0xff]  ;;  %s1886_s12 = smov 80   ;;  %s1887_s1 = smov 112   ;;  %vm1045_vm8 = vcmask 15360   ;;  %vm1168_vm9 = vcmask 1041408   ;;  %vm1480_vm14 = vcmask 277760  }
   0x7   :  { %s1888_s13 = smov 48   ;;  %s1889_s14 = smov 32  }
   0x8   :  { %s1890_s15 = smov 16   ;;  %s1891_s26 = smov [#allocation2]  }
   0x9   :  { %1733 = vmatpush3.bf16.msra.mxu0 %v1730_v6  ;;  %s1488_s27 = sshll.u32 %s1891_s26, 4  ;;  %s1489_s27 = int_to_ptr.vmem [resolvable:$true] %s1488_s27 }
   0xa   :  { %1608 = vmatprep.subr.mxu0 %v1882_v8  ;;  %s1858_s28 = scalar_lea.vmem %s1489_s27, 256  ;;  %p1863_p1 = scmp.lt.s32.totalorder %s1489_s27, %s1489_s27 }
   0xb   :  { %p1859_p0 = scmp.ne.s32.totalorder %s1489_s27, %s1858_s28  ;;  %p1864_p2 = scmp.lt.s32.totalorder %s1858_s28, %s1858_s28 }
   0xc   :  { %1606 = vmatmul.mubr.msk.f32.vlgmr.msra.gmra.mrb[0].mxu0 %vm43_vm0, %v1958_v7 }
   0xd   :  { %1610 = vmatprep.mubr.msk.f32.mxu0 %vm1883_vm1, %v1882_v8  ;;  %p1865_p3 = por %p1864_p2, %p1863_p1 }
   0xf   :  { %p1866_p4 = pnand %p1865_p3, %p1859_p0 }
  0xdf   :  { %v1607_v10 = vpop.f32.mrb[0].mxu0 }
  0xe0   :  { %v116_v11 = vpop.f32.mrb[1].mxu0  ;;  %v1974_v13 = vadd.f32 %v1607_v10, %v1499_v9 }
  0xe1   :  { %v1971_v12 = vadd.f32 %v1499_v9, %v116_v11 }
  0xe3   :  { %126 = vrot.lane.b32.xlu0 %v1971_v12, %s1884_s0 }
  0xe7   :  { %204 = vrot.lane.b32.xlu0 %v1974_v13, %s1884_s0 }
 0x155   :  { %v127_v14 = vpop.permute.xlu0 %126 }
 0x156   :  { %1609 = vmatpush3.xpose.msk.msra.mxu0 %vm128_vm2, %v127_v14 }
 0x157   :  { %1613 = vmatprep.subr.mxu0 %v1882_v8 }
 0x159   :  { %1611 = vmatmul.mubr.msk.f32.vlgmr.msra.gmra.mrb[2].mxu0 %vm128_vm2, %v1971_v12  ;;  %v205_v15 = vpop.permute.xlu0 %204 }
 0x15a   :  { %1614 = vmatpush3.xpose.msk.msra.mxu0 %vm128_vm2, %v205_v15  ;;  %1615 = vmatprep.mubr.msk.f32.mxu0 %vm1883_vm1, %v1882_v8  ;;  %v1809_v15 = vpack.i.bf16 %v1944_v4, %v1937_v2 }
 0x15b   :  { %1618 = vmatprep.subr.mxu0 %v1882_v8 }
 0x15d   :  { %1616 = vmatmul.mubr.msk.f32.vlgmr.msra.gmra.mrb[4].mxu0 %vm128_vm2, %v1974_v13 }
 0x15e   :  { %1620 = vmatprep.mubr.msk.f32.mxu0 %vm1883_vm1, %v1882_v8 }
 0x22c   :  { %v199_v17 = vpop.f32.mrb[2].mxu0 }
 0x22d   :  { %v200_v18 = vadd.f32 %v199_v17, %v1992_v16  ;;  %v1612_v19 = vpop.f32.mrb[3].mxu0 }
 0x22f   :  { %v281_v21 = vsel %vm280_vm3, %v200_v18, -inf }
 0x230   :  { %282 = vmax.xlane.f32.xlu1 %v281_v21  ;;  %v276_v22 = vpop.f32.mrb[4].mxu0 }
 0x231   :  { %v277_v23 = vadd.f32 %v276_v22, %v1998_v20  ;;  %v1617_v24 = vpop.f32.mrb[5].mxu0 }
 0x233   :  { %v284_v25 = vsel %vm280_vm3, %v277_v23, -inf }
 0x234   :  { %285 = vmax.xlane.f32.xlu1 %v284_v25 }
 0x245   :  { %303 = vrot.lane.b32.xlu1 %v1971_v12, %s1885_s11 }
 0x249   :  { %379 = vrot.lane.b32.xlu1 %v1974_v13, %s1885_s11 }
 0x24d   :  { %457 = vrot.lane.b32.xlu1 %v1971_v12, %s1886_s12 }
 0x251   :  { %535 = vrot.lane.b32.xlu1 %v1974_v13, %s1886_s12 }
 0x2bd   :  { %v283_v26 = vpop.xlane.xlu1 %282 }
 0x2be   :  { %v287_v27 = vsub.f32 %v200_v18, %v283_v26 }
 0x2c0   :  { %v289_v28 = vmul.f32 1.442695, %v287_v27 }
 0x2c1   :  { %v286_v29 = vpop.xlane.xlu1 %285 }
 0x2c2   :  { %1814 = vpow2.f32 %v289_v28  ;;  %v288_v30 = vsub.f32 %v277_v23, %v286_v29 }
 0x2c4   :  { %v291_v31 = vmul.f32 1.442695, %v288_v30 }
 0x2c5   :  { %v304_v32 = vpop.permute.xlu1 %303 }
 0x2c6   :  { %1816 = vpow2.f32 %v291_v31  ;;  %1619 = vmatpush3.msra.mxu0 %v304_v32 }
 0x2c7   :  { %1628 = vmatprep.subr.mxu0 %v1882_v8 }
 0x2c9   :  { %v380_v33 = vpop.permute.xlu1 %379 }
 0x2ca   :  { %1624 = vmatpush3.msra.mxu1 %v380_v33 }
 0x2cb   :  { %1633 = vmatprep.subr.mxu1 %v1882_v8 }
 0x2cc   :  { %v1815_v34 = vpop.eup %1814 }
 0x2cd   :  { %v293_v35 = vsel %vm280_vm3, %v1815_v34, 0.0  ;;  %v458_v38 = vpop.permute.xlu1 %457 }
 0x2ce   :  { %294 = vadd.xlane.f32.xlu0 %v293_v35 }
 0x2d0   :  { %v1817_v36 = vpop.eup %1816 }
 0x2d1   :  { %v296_v37 = vsel %vm280_vm3, %v1817_v36, 0.0  ;;  %v536_v39 = vpop.permute.xlu1 %535 }
 0x2d2   :  { %297 = vadd.xlane.f32.xlu1 %v296_v37 }
 0x2e3   :  { %533 = vrot.lane.b32.xlu1 %v1974_v13, %s1887_s1 }
 0x2e4   :  { %455 = vrot.lane.b32.xlu0 %v1971_v12, %s1887_s1 }
 0x35b   :  { %v295_v40 = vpop.xlane.xlu0 %294 }
 0x35c   :  { %1818 = vrcp.f32 %v295_v40 }
 0x35f   :  { %v298_v41 = vpop.xlane.xlu1 %297  ;;  %v456_v46 = vpop.permute.xlu0 %455 }
 0x360   :  { %1820 = vrcp.f32 %v298_v41 }
 0x363   :  { %v534_v47 = vpop.permute.xlu1 %533 }
 0x366   :  { %v1819_v42 = vpop.eup %1818 }
 0x367   :  { %v301_v43 = vmul.f32 %v1819_v42, %v1815_v34  ;;  %v1514_v34 = vld [vmem:[%s2226_s4 + $0x1] ss:$0 sm:$0xff] }
 0x369   :  { %1621 = vmatmul.mubr.msk.f32.vlgmr.msra.gmra.mrb[6].mxu0 %vm280_vm3, %v301_v43 }
 0x36a   :  { %v1821_v44 = vpop.eup %1820  ;;  %1629 = vmatpush3.xpose.msk.msra.mxu0 %vm128_vm2, %v458_v38  ;;  %1630 = vmatprep.mubr.msk.f32.mxu0 %vm1883_vm1, %v1882_v8 }
 0x36b   :  { %v302_v45 = vmul.f32 %v1821_v44, %v1817_v36  ;;  %1638 = vmatprep.subr.mxu0 %v1882_v8 }
 0x36d   :  { %1626 = vmatmul.mubr.msk.f32.vlgmr.msra.gmra.mrb[0].mxu1 %vm280_vm3, %v302_v45  ;;  %1631 = vmatmul.mubr.msk.f32.vlgmr.msra.gmra.mrb[8].mxu0 %vm128_vm2, %v456_v46 }
 0x36e   :  { %1634 = vmatpush3.xpose.msk.msra.mxu1 %vm128_vm2, %v536_v39  ;;  %1635 = vmatprep.mubr.msk.f32.mxu1 %vm1883_vm1, %v1882_v8 }
 0x36f   :  { %1643 = vmatprep.subr.mxu1 %v1882_v8  ;;  %1640 = vmatprep.mubr.msk.f32.mxu0 %vm1883_vm1, %v1882_v8 }
 0x371   :  { %1636 = vmatmul.mubr.msk.f32.vlgmr.msra.gmra.mrb[2].mxu1 %vm128_vm2, %v534_v47 }
 0x372   :  { %1645 = vmatprep.mubr.msk.f32.mxu1 %vm1883_vm1, %v1882_v8 }
 0x43c   :  { %v2029_v48 = vpop.f32.mrb[6].mxu0 }
 0x43d   :  { %v1622_v49 = vpop.f32.mrb[7].mxu0 }
 0x440   :  { %v2031_v50 = vpop.f32.mrb[0].mxu1  ;;  %v529_v51 = vpop.f32.mrb[8].mxu0 }
 0x441   :  { %v530_v52 = vadd.f32 %v529_v51, %v1992_v16  ;;  %v1627_v53 = vpop.f32.mrb[1].mxu1  ;;  %v1632_v54 = vpop.f32.mrb[9].mxu0 }
 0x442   :  { %v958_v53 = vld [vmem:[%s2224_s2 + $0x40] sm:$0xff] }
 0x443   :  { %v611_v55 = vsel %vm280_vm3, %v530_v52, -inf }
 0x444   :  { %v607_v56 = vpop.f32.mrb[2].mxu1  ;;  %612 = vmax.xlane.f32.xlu1 %v611_v55  ;;  %v959_v55 = vld [vmem:[%s2224_s2 + $0x58] sm:$0xff] }
 0x445   :  { %v608_v57 = vadd.f32 %v607_v56, %v1998_v20  ;;  %v1637_v58 = vpop.f32.mrb[3].mxu1  ;;  %v1746_v56 = vpack.c.bf16 %v959_v55, %v958_v53  ;;  %v1251_v55 = vld [vmem:[%s2225_s3 + $0x10] sm:$0xff] }
 0x446   :  { %v1069_v58 = vld [vmem:[%s2224_s2 + $0x20] sm:$0xff] }
 0x447   :  { %v614_v59 = vsel %vm280_vm3, %v608_v57, -inf }
 0x448   :  { %615 = vmax.xlane.f32.xlu0 %v614_v59 }
 0x45e   :  { %709 = vrot.lane.b32.xlu0 %v1974_v13, %s1888_s13  ;;  %v1804_v13 = vpack.i.bf16 %v1932_v1, %v1927_v0 }
 0x4d1   :  { %v613_v60 = vpop.xlane.xlu1 %612 }
 0x4d2   :  { %v617_v61 = vsub.f32 %v530_v52, %v613_v60  ;;  %v957_v52 = vld [vmem:[%s2224_s2 + $0x28] sm:$0xff] }
 0x4d4   :  { %v619_v62 = vmul.f32 1.442695, %v617_v61 }
 0x4d5   :  { %v616_v63 = vpop.xlane.xlu0 %615 }
 0x4d6   :  { %1822 = vpow2.f32 %v619_v62  ;;  %v618_v3 = vsub.f32 %v608_v57, %v616_v63  ;;  %v1068_v57 = vld [vmem:[%s2224_s2 + $0x8] sm:$0xff] }
 0x4d7   :  { %v1750_v59 = vpack.c.bf16 %v1069_v58, %v1068_v57  ;;  %v1253_v58 = vld [vmem:[%s2225_s3 + $0x20] sm:$0xff] }
 0x4d8   :  { %v621_v6 = vmul.f32 1.442695, %v618_v3 }
 0x4d9   :  { %v710_v8 = vpop.permute.xlu0 %709 }
 0x4da   :  { %1824 = vpow2.f32 %v621_v6  ;;  %1644 = vmatpush3.msra.mxu1 %v710_v8 }
 0x4e0   :  { %v1823_v9 = vpop.eup %1822 }
 0x4e1   :  { %v623_v10 = vsel %vm280_vm3, %v1823_v9, 0.0 }
 0x4e2   :  { %624 = vadd.xlane.f32.xlu1 %v623_v10 }
 0x4e4   :  { %v1825_v11 = vpop.eup %1824 }
 0x4e5   :  { %v626_v14 = vsel %vm280_vm3, %v1825_v11, 0.0 }
 0x4e6   :  { %627 = vadd.xlane.f32.xlu1 %v626_v14 }
 0x4f7   :  { %633 = vrot.lane.b32.xlu1 %v1971_v12, %s1888_s13 }
 0x4fb   :  { %1805 = vrot.lane.b32.xlu1 %v1804_v13, %s1889_s14 }
 0x4ff   :  { %1810 = vrot.lane.b32.xlu1 %v1809_v15, %s1889_s14 }
 0x56f   :  { %v625_v16 = vpop.xlane.xlu1 %624 }
 0x570   :  { %1826 = vrcp.f32 %v625_v16 }
 0x573   :  { %v628_v17 = vpop.xlane.xlu1 %627 }
 0x574   :  { %1828 = vrcp.f32 %v628_v17 }
 0x577   :  { %v634_v18 = vpop.permute.xlu1 %633 }
 0x578   :  { %1639 = vmatpush3.msra.mxu0 %v634_v18 }
 0x57a   :  { %v1827_v19 = vpop.eup %1826 }
 0x57b   :  { %v631_v20 = vmul.f32 %v1827_v19, %v1823_v9  ;;  %v1806_v1 = vpop.permute.xlu1 %1805  ;;  %v1517_v19 = vld [vmem:[%s2226_s4 + $0x2] ss:$0 sm:$0xff] }
 0x57c   :  { %v1808_v21 = vunpack.i.h.bf16 %v1806_v1  ;;  %v1807_v22 = vunpack.i.l.bf16 %v1806_v1 }
 0x57d   :  { %1641 = vmatmul.mubr.msk.f32.vlgmr.msra.gmra.mrb[10].mxu0 %vm280_vm3, %v631_v20 }
 0x57e   :  { %v1829_v12 = vpop.eup %1828  ;;  %v1734_v2 = vpack.c.bf16 %v1808_v21, %v1807_v22 }
 0x57f   :  { %v632_v0 = vmul.f32 %v1829_v12, %v1825_v11  ;;  %v1811_v4 = vpop.permute.xlu1 %1810 }
 0x580   :  { %v1813_v23 = vunpack.i.h.bf16 %v1811_v4  ;;  %v1812_v24 = vunpack.i.l.bf16 %v1811_v4  ;;  %1735 = vmatprep.subr.bf16.mxu0 %v1734_v2  ;;  %v1070_v4 = vld [vmem:[%s2224_s2 + $0x38] sm:$0xff] }
 0x581   :  { %1646 = vmatmul.mubr.msk.f32.vlgmr.msra.gmra.mrb[4].mxu1 %vm280_vm3, %v632_v0  ;;  %1737 = vmatpush3.bf16.msra.mxu0 %v1734_v2  ;;  %v1518_v0 = vld [vmem:[%s2226_s4 + $0x3] ss:$0 sm:$0xff] }
 0x582   :  { %v1738_v25 = vpack.c.bf16 %v1813_v23, %v1812_v24  ;;  %v1071_v23 = vld [vmem:[%s2224_s2 + $0x50] sm:$0xff] }
 0x584   :  { %1739 = vmatprep.subr.bf16.mxu0 %v1738_v25 }
 0x585   :  { %1741 = vmatpush3.bf16.msra.mxu0 %v1738_v25 }
 0x650   :  { %v705_v26 = vpop.f32.mrb[10].mxu0 }
 0x651   :  { %787 = vrot.lane.b32.xlu0 %v705_v26, %s1890_s15  ;;  %v1642_v27 = vpop.f32.mrb[11].mxu0  ;;  %v1754_v26 = vpack.c.bf16 %v1071_v23, %v1070_v4 }
 0x652   :  { %v1519_v27 = vld [vmem:[%s2226_s4 + $0x6] ss:$0 sm:$0xff] }
 0x654   :  { %v781_v28 = vpop.f32.mrb[4].mxu1 }
 0x655   :  { %789 = vrot.lane.b32.xlu1 %v781_v28, %s1890_s15  ;;  %v1647_v29 = vpop.f32.mrb[5].mxu1 }
 0x6c3   :  { %v788_v30 = vpop.permute.xlu0 %787 }
 0x6c4   :  { %v793_v31 = vsel %vm128_vm2, %v2029_v48, %v788_v30 }
 0x6c5   :  { %1656 = vmatprep.mubr.msk.f32.mxu0 %vm43_vm0, %v793_v31 }
 0x6c7   :  { %v790_v32 = vpop.permute.xlu1 %789 }
 0x6c8   :  { %v794_v33 = vsel %vm128_vm2, %v2031_v50, %v790_v32 }
 0x6c9   :  { %1657 = vmatmul.mubr.msk.f32.vlgmr.msra.gmra.mrb[12].mxu0 %vm43_vm0, %v794_v33 }
 0x79c   :  { %v1658_v35 = vpop.f32.mrb[12].mxu0 }
 0x79d   :  { %v897_v36 = vadd.f32 %v1658_v35, %v1514_v34  ;;  %v891_v37 = vpop.f32.mrb[13].mxu0 }
 0x79e   :  { %v892_v38 = vadd.f32 %v1514_v34, %v891_v37 }
 0x79f   :  { %v901_v39 = vadd.f32 %v897_v36, %v1958_v7 }
 0x7a0   :  { %v900_v40 = vadd.f32 %v892_v38, %v1949_v5  ;;  %v956_v5 = vld [vmem:[%s2224_s2 + $0x10] sm:$0xff] }
 0x7a1   :  { %v905_v41 = vsel %vm43_vm0, %v901_v39, 0.0  ;;  %v1742_v54 = vpack.c.bf16 %v957_v52, %v956_v5 }
 0x7a2   :  { %906 = vadd.xlane.f32.xlu1 %v905_v41  ;;  %v902_v42 = vsel %vm43_vm0, %v900_v40, 0.0 }
 0x7a3   :  { %903 = vadd.xlane.f32.xlu0 %v902_v42  ;;  %1743 = vmatprep.subr.bf16.mxu0 %v1742_v54 }
 0x7a4   :  { %1745 = vmatpush3.bf16.msra.mxu0 %v1742_v54 }
 0x7a5   :  { %1747 = vmatprep.subr.bf16.mxu0 %v1746_v56 }
 0x7a8   :  { %1749 = vmatpush3.bf16.msra.mxu0 %v1746_v56  ;;  %v1252_v56 = vld [vmem:[%s2225_s3 + $0x18] sm:$0xff] }
 0x7a9   :  { %1751 = vmatprep.subr.bf16.mxu0 %v1750_v59  ;;  %v1762_v57 = vpack.c.bf16 %v1252_v56, %v1251_v55 }
 0x82f   :  { %v907_v43 = vpop.xlane.xlu1 %906 }
 0x830   :  { %v910_v44 = vmul.f32 0.03125, %v907_v43  ;;  %v904_v45 = vpop.xlane.xlu0 %903 }
 0x831   :  { %v909_v46 = vmul.f32 0.03125, %v904_v45 }
 0x832   :  { %v912_v47 = vsub.f32 %v901_v39, %v910_v44 }
 0x833   :  { %v911_v48 = vsub.f32 %v900_v40, %v909_v46  ;;  %v34_v46 = vld [vmem:[%s2226_s4 + $0xa] sm:$0x3] }
 0x834   :  { %v914_v51 = vmul.f32 %v912_v47, %v912_v47  ;;  %v947_v21 = vmul.f32 %v1517_v19, %v912_v47  ;;  %1681 = vmatprep.subr.msk.mxu1 %vm1168_vm9, %v34_v46  ;;  %v33_v47 = vld [vmem:[%s2226_s4 + $0x8] sm:$0x3] }
 0x835   :  { %v913_v49 = vmul.f32 %v911_v48, %v911_v48  ;;  %v946_v20 = vmul.f32 %v1517_v19, %v911_v48  ;;  %1682 = vmatpush3.msk.msra.mxu1 %vm1168_vm9, %v34_v46  ;;  %v1522_v19 = vld [vmem:[%s2226_s4 + $0x7] ss:$0 sm:$0xff] }
 0x836   :  { %v918_v7 = vsel %vm43_vm0, %v914_v51, 0.0  ;;  %1686 = vmatprep.subr.msk.mxu1 %vm1168_vm9, %v33_v47  ;;  %v1249_v51 = vld [vmem:[%s2225_s3] sm:$0xff] }
 0x837   :  { %v915_v50 = vsel %vm43_vm0, %v913_v49, 0.0 }
 0x838   :  { %916 = vadd.xlane.f32.xlu0 %v915_v50 }
 0x83c   :  { %919 = vadd.xlane.f32.xlu0 %v918_v7  ;;  %v1250_v7 = vld [vmem:[%s2225_s3 + $0x8] sm:$0xff] }
 0x83d   :  { %v1758_v54 = vpack.c.bf16 %v1250_v7, %v1249_v51 }
 0x8c5   :  { %v917_v60 = vpop.xlane.xlu0 %916 }
 0x8c6   :  { %v922_v61 = vmul.f32 0.032258064, %v917_v60 }
 0x8c8   :  { %1830 = vrsqrt.f32 %v922_v61  ;;  %vm926_vm4 = vcmp.eq.f32.partialorder %v922_v61, inf  ;;  %v929_v8 = vand.u32 2147483648, %v922_v61  ;;  %vm928_vm5 = vcmp.eq.f32.partialorder %v922_v61, 0.0 }
 0x8c9   :  { %v920_v62 = vpop.xlane.xlu0 %919 }
 0x8ca   :  { %v923_v63 = vmul.f32 0.032258064, %v920_v62  ;;  %v1256_v62 = vld [vmem:[%s2225_s3 + $0x38] sm:$0xff] }
 0x8cc   :  { %1832 = vrsqrt.f32 %v923_v63  ;;  %vm933_vm6 = vcmp.eq.f32.partialorder %v923_v63, inf  ;;  %v936_v15 = vand.u32 2147483648, %v923_v63  ;;  %vm935_vm7 = vcmp.eq.f32.partialorder %v923_v63, 0.0 }
 0x8d2   :  { %v1831_v3 = vpop.eup %1830 }
 0x8d3   :  { %v925_v6 = vmul.f32 %v1831_v3, %v922_v61  ;;  %v1257_v3 = vld [vmem:[%s2225_s3 + $0x40] sm:$0xff] }
 0x8d5   :  { %v927_v9 = vsel %vm926_vm4, %v922_v61, %v925_v6  ;;  %v1255_v61 = vld [vmem:[%s2225_s3 + $0x30] sm:$0xff]  ;;  %v1258_v6 = vld [vmem:[%s2225_s3 + $0x48] sm:$0xff] }
 0x8d6   :  { %v1833_v10 = vpop.eup %1832  ;;  %v930_v11 = vsel %vm928_vm5, %v929_v8, %v927_v9  ;;  %v1774_v8 = vpack.c.bf16 %v1258_v6, %v1257_v3  ;;  %v1259_v9 = vld [vmem:[%s2225_s3 + $0x50] sm:$0xff]  ;;  %v1532_v6 = vld [vmem:[%s2226_s4 + $0x5] ss:$0 sm:$0xff] }
 0x8d7   :  { %v932_v14 = vmul.f32 %v1833_v10, %v923_v63  ;;  %v938_v13 = vadd.f32 1e-06, %v930_v11  ;;  %v1260_v10 = vld [vmem:[%s2225_s3 + $0x58] sm:$0xff] }
 0x8d8   :  { %v1778_v11 = vpack.c.bf16 %v1260_v10, %v1259_v9 }
 0x8d9   :  { %v934_v16 = vsel %vm933_vm6, %v923_v63, %v932_v14  ;;  %1834 = vrcp.f32 %v938_v13  ;;  %v1770_v63 = vpack.c.bf16 %v1256_v62, %v1255_v61  ;;  %v1261_v14 = vld [vmem:[%s2225_s3 + $0x60] sm:$0xff]  ;;  %v1262_v13 = vld [vmem:[%s2225_s3 + $0x68] sm:$0xff] }
 0x8da   :  { %v937_v17 = vsel %vm935_vm7, %v936_v15, %v934_v16  ;;  %v1782_v15 = vpack.c.bf16 %v1262_v13, %v1261_v14  ;;  %v1263_v16 = vld [vmem:[%s2225_s3 + $0x70] sm:$0xff]  ;;  %v1531_v61 = vld [vmem:[%s2226_s4 + $0x4] ss:$0 sm:$0xff] }
 0x8db   :  { %v939_v18 = vadd.f32 1e-06, %v937_v17  ;;  %v1264_v17 = vld [vmem:[%s2225_s3 + $0x78] sm:$0xff] }
 0x8dd   :  { %1836 = vrcp.f32 %v939_v18  ;;  %v1786_v18 = vpack.c.bf16 %v1264_v17, %v1263_v16 }
 0x8e3   :  { %v1835_v12 = vpop.eup %1834 }
 0x8e4   :  { %v948_v1 = vmul.f32 %v1835_v12, %v946_v20 }
 0x8e6   :  { %v2088_v22 = vadd.f32 %v1518_v0, %v948_v1 }
 0x8e7   :  { %v1837_v2 = vpop.eup %1836 }
 0x8e8   :  { %v949_v24 = vmul.f32 %v1837_v2, %v947_v21  ;;  %1667 = vmatprep.mubr.msk.f32.mxu0 %vm43_vm0, %v2088_v22 }
 0x8ea   :  { %v2098_v25 = vadd.f32 %v1518_v0, %v949_v24 }
 0x8ec   :  { %1668 = vmatmul.mubr.msk.f32.vlgmr.msra.gmra.mrb[14].mxu0 %vm43_vm0, %v2098_v25 }
 0x8ed   :  { %1753 = vmatpush3.bf16.msra.mxu0 %v1750_v59  ;;  %1678 = vmatprep.mubr.msk.f32.mxu0 %vm43_vm0, %v2088_v22  ;;  %v1254_v59 = vld [vmem:[%s2225_s3 + $0x28] sm:$0xff] }
 0x8ee   :  { %1755 = vmatprep.subr.bf16.mxu0 %v1754_v26  ;;  %v1766_v60 = vpack.c.bf16 %v1254_v59, %v1253_v58 }
 0x8f1   :  { %1757 = vmatpush3.bf16.msra.mxu0 %v1754_v26 }
 0x8f4   :  { %1679 = vmatmul.mubr.msk.f32.vlgmr.msra.gmra.mrb[16].mxu0 %vm43_vm0, %v2098_v25 }
 0x9bf   :  { %v1669_v28 = vpop.f32.mrb[14].mxu0 }
 0x9c0   :  { %v1042_v29 = vadd.f32 %v1669_v28, %v1519_v27  ;;  %v1036_v30 = vpop.f32.mrb[15].mxu0 }
 0x9c1   :  { %v1037_v31 = vadd.f32 %v1519_v27, %v1036_v30 }
 0x9c2   :  { %v1049_v32 = vsel %vm1045_vm8, %v1042_v29, -inf }
 0x9c3   :  { %1050 = vmax.xlane.f32.xlu0 %v1049_v32  ;;  %v1046_v33 = vsel %vm1045_vm8, %v1037_v31, -inf }
 0x9c4   :  { %1047 = vmax.xlane.f32.xlu1 %v1046_v33 }
 0x9c7   :  { %v2111_v34 = vpop.f32.mrb[16].mxu0 }
 0x9c8   :  { %v2113_v35 = vpop.f32.mrb[17].mxu0  ;;  %v1148_v20 = vadd.f32 %v2111_v34, %v1522_v19 }
 0x9c9   :  { %v1143_v12 = vadd.f32 %v1522_v19, %v2113_v35 }
 0x9ca   :  { %v1155_v0 = vmul.f32 0.70710677, %v1148_v20  ;;  %v1152_v24 = vmul.f32 0.5, %v1148_v20 }
 0x9cb   :  { %v1154_v1 = vmul.f32 0.70710677, %v1143_v12  ;;  %v1151_v26 = vmul.f32 0.5, %v1143_v12 }
 0xa50   :  { %v1051_v36 = vpop.xlane.xlu0 %1050 }
 0xa51   :  { %v1053_v37 = vsub.f32 %v1042_v29, %v1051_v36  ;;  %v1048_v38 = vpop.xlane.xlu1 %1047 }
 0xa52   :  { %v1052_v39 = vsub.f32 %v1037_v31, %v1048_v38 }
 0xa53   :  { %v1056_v40 = vmul.f32 1.442695, %v1053_v37 }
 0xa54   :  { %v1054_v41 = vmul.f32 1.442695, %v1052_v39 }
 0xa55   :  { %1838 = vpow2.f32 %v1056_v40 }
 0xa56   :  { %1840 = vpow2.f32 %v1054_v41 }
 0xa5f   :  { %v1839_v42 = vpop.eup %1838 }
 0xa60   :  { %v1841_v43 = vpop.eup %1840  ;;  %v1061_v44 = vsel %vm1045_vm8, %v1839_v42, 0.0 }
 0xa61   :  { %1062 = vadd.xlane.f32.xlu0 %v1061_v44  ;;  %v1058_v45 = vsel %vm1045_vm8, %v1841_v43, 0.0 }
 0xa62   :  { %1059 = vadd.xlane.f32.xlu1 %v1058_v45 }
 0xaee   :  { %v1063_v48 = vpop.xlane.xlu0 %1062 }
 0xaef   :  { %1842 = vrcp.f32 %v1063_v48  ;;  %v1060_v49 = vpop.xlane.xlu1 %1059 }
 0xaf0   :  { %1844 = vrcp.f32 %v1060_v49 }
 0xaf1   :  { %1846 = verf.f32 %v1155_v0 }
 0xaf2   :  { %1848 = verf.f32 %v1154_v1 }
 0xaf9   :  { %v1843_v50 = vpop.eup %1842 }
 0xafa   :  { %v1845_v5 = vpop.eup %1844  ;;  %v2134_v53 = vmul.f32 %v1843_v50, %v1839_v42 }
 0xafb   :  { %v2132_v52 = vmul.f32 %v1845_v5, %v1841_v43  ;;  %v1847_v21 = vpop.eup %1846 }
 0xafc   :  { %v1849_v2 = vpop.eup %1848  ;;  %v1159_v4 = vadd.f32 1.0, %v1847_v21 }
 0xafd   :  { %1683 = vmatprep.mubr.msk.f32.mxu1 %vm1045_vm8, %v2132_v52  ;;  %v1158_v23 = vadd.f32 1.0, %v1849_v2 }
 0xafe   :  { %1684 = vmatmul.mubr.msk.f32.vlgmr.msra.gmra.mrb[6].mxu1 %vm1045_vm8, %v2134_v53  ;;  %v1161_v27 = vmul.f32 %v1159_v4, %v1152_v24 }
 0xaff   :  { %1688 = vmatprep.mubr.msk.f32.mxu1 %vm1045_vm8, %v2132_v52  ;;  %1687 = vmatpush3.msk.msra.mxu1 %vm1168_vm9, %v33_v47  ;;  %v1160_v29 = vmul.f32 %v1158_v23, %v1151_v26 }
 0xb00   :  { %1759 = vmatprep.subr.bf16.mxu1 %v1758_v54 }
 0xb02   :  { %1689 = vmatmul.mubr.msk.f32.vlgmr.msra.gmra.mrb[8].mxu1 %vm1045_vm8, %v2134_v53 }
 0xb03   :  { %1761 = vmatpush3.bf16.msra.mxu1 %v1758_v54 }
 0xb04   :  { %1763 = vmatprep.subr.bf16.mxu1 %v1762_v57 }
 0xb07   :  { %1765 = vmatpush3.bf16.msra.mxu1 %v1762_v57 }
 0xb08   :  { %1767 = vmatprep.subr.bf16.mxu1 %v1766_v60 }
 0xb0b   :  { %1769 = vmatpush3.bf16.msra.mxu1 %v1766_v60 }
 0xb0c   :  { %1771 = vmatprep.subr.bf16.mxu1 %v1770_v63 }
 0xb0f   :  { %1773 = vmatpush3.bf16.msra.mxu1 %v1770_v63 }
 0xb10   :  { %1775 = vmatprep.subr.bf16.mxu1 %v1774_v8 }
 0xb13   :  { %1777 = vmatpush3.bf16.msra.mxu1 %v1774_v8 }
 0xb14   :  { %1779 = vmatprep.subr.bf16.mxu1 %v1778_v11 }
 0xb17   :  { %1781 = vmatpush3.bf16.msra.mxu1 %v1778_v11 }
 0xb18   :  { %1783 = vmatprep.subr.bf16.mxu1 %v1782_v15 }
 0xb1b   :  { %1785 = vmatpush3.bf16.msra.mxu1 %v1782_v15 }
 0xb1c   :  { %1787 = vmatprep.subr.bf16.mxu1 %v1786_v18 }
 0xb1f   :  { %1789 = vmatpush3.bf16.msra.mxu1 %v1786_v18 }
 0xbd1   :  { %v1685_v28 = vpop.f32.mrb[6].mxu1 }
 0xbd2   :  { %v1248_v30 = vmul.f32 %v1685_v28, %v1161_v27  ;;  %v1238_v31 = vpop.f32.mrb[7].mxu1 }
 0xbd3   :  { %v1247_v32 = vmul.f32 %v1238_v31, %v1160_v29 }
 0xbd5   :  { %1723 = vmatprep.mubr.f32.mxu1 %v1247_v32 }
 0xbd6   :  { %1724 = vmatmul.mubr.f32.vlgmr.msra.gmra.mrb[8].mxu1 %v1248_v30 }
 0xca9   :  { %v1725_v33 = vpop.f32.mrb[8].mxu1 }
 0xcaa   :  { %v1419_v34 = vadd.f32 %v1725_v33, %v2098_v25  ;;  %v1409_v35 = vpop.f32.mrb[9].mxu1 }
 0xcab   :  { %v1418_v36 = vadd.f32 %v1409_v35, %v2088_v22 }
 0xcac   :  { %v1423_v37 = vsel %vm43_vm0, %v1419_v34, 0.0 }
 0xcad   :  { %1424 = vadd.xlane.f32.xlu0 %v1423_v37  ;;  %v1420_v38 = vsel %vm43_vm0, %v1418_v36, 0.0 }
 0xcae   :  { %1421 = vadd.xlane.f32.xlu1 %v1420_v38 }
 0xd3a   :  { %v1425_v39 = vpop.xlane.xlu0 %1424 }
 0xd3b   :  { %v1427_v40 = vmul.f32 0.03125, %v1425_v39  ;;  %v1422_v41 = vpop.xlane.xlu1 %1421 }
 0xd3c   :  { %v1426_v42 = vmul.f32 0.03125, %v1422_v41 }
 0xd3d   :  { %v1429_v43 = vsub.f32 %v1419_v34, %v1427_v40 }
 0xd3e   :  { %v1428_v44 = vsub.f32 %v1418_v36, %v1426_v42 }
 0xd3f   :  { %v1431_v45 = vmul.f32 %v1429_v43, %v1429_v43  ;;  %v1463_v62 = vmul.f32 %v1531_v61, %v1429_v43 }
 0xd40   :  { %v1430_v46 = vmul.f32 %v1428_v44, %v1428_v44  ;;  %v1462_v3 = vmul.f32 %v1531_v61, %v1428_v44 }
 0xd41   :  { %v1435_v47 = vsel %vm43_vm0, %v1431_v45, 0.0 }
 0xd42   :  { %1436 = vadd.xlane.f32.xlu0 %v1435_v47  ;;  %v1432_v25 = vsel %vm43_vm0, %v1430_v46, 0.0 }
 0xd43   :  { %1433 = vadd.xlane.f32.xlu1 %v1432_v25 }
 0xd54   :  { %1474 = vrot.lane.b32.xlu1 %v2132_v52, %s1889_s14 }
 0xd58   :  { %1476 = vrot.lane.b32.xlu0 %v2134_v53, %s1889_s14 }
 0xdcf   :  { %v1437_v22 = vpop.xlane.xlu0 %1436 }
 0xdd0   :  { %v1439_v48 = vmul.f32 0.032258064, %v1437_v22  ;;  %v1434_v49 = vpop.xlane.xlu1 %1433 }
 0xdd1   :  { %v1438_v50 = vmul.f32 0.032258064, %v1434_v49 }
 0xdd2   :  { %1850 = vrsqrt.f32 %v1439_v48  ;;  %vm1449_vm10 = vcmp.eq.f32.partialorder %v1439_v48, inf  ;;  %v1452_v54 = vand.u32 2147483648, %v1439_v48  ;;  %vm1451_vm11 = vcmp.eq.f32.partialorder %v1439_v48, 0.0 }
 0xdd3   :  { %1852 = vrsqrt.f32 %v1438_v50  ;;  %vm1442_vm12 = vcmp.eq.f32.partialorder %v1438_v50, inf  ;;  %v1445_v57 = vand.u32 2147483648, %v1438_v50  ;;  %vm1444_vm13 = vcmp.eq.f32.partialorder %v1438_v50, 0.0  ;;  %v1477_v13 = vpop.permute.xlu0 %1476 }
 0xdd4   :  { %v1475_v15 = vpop.permute.xlu1 %1474 }
 0xddc   :  { %v1851_v51 = vpop.eup %1850 }
 0xddd   :  { %v1853_v7 = vpop.eup %1852  ;;  %v1448_v5 = vmul.f32 %v1851_v51, %v1439_v48 }
 0xdde   :  { %v1441_v55 = vmul.f32 %v1853_v7, %v1438_v50 }
 0xddf   :  { %v1450_v56 = vsel %vm1449_vm10, %v1439_v48, %v1448_v5 }
 0xde0   :  { %v1443_v52 = vsel %vm1442_vm12, %v1438_v50, %v1441_v55  ;;  %v1453_v58 = vsel %vm1451_vm11, %v1452_v54, %v1450_v56 }
 0xde1   :  { %v1455_v53 = vadd.f32 1e-06, %v1453_v58  ;;  %v1446_v59 = vsel %vm1444_vm13, %v1445_v57, %v1443_v52 }
 0xde2   :  { %v1454_v60 = vadd.f32 1e-06, %v1446_v59 }
 0xde3   :  { %1854 = vrcp.f32 %v1455_v53 }
 0xde4   :  { %1856 = vrcp.f32 %v1454_v60 }
 0xded   :  { %v1855_v63 = vpop.eup %1854 }
 0xdee   :  { %v1857_v8 = vpop.eup %1856  ;;  %v1465_v9 = vmul.f32 %v1855_v63, %v1463_v62 }
 0xdef   :  { %v1464_v10 = vmul.f32 %v1857_v8, %v1462_v3 }
 0xdf0   :  { %v1471_v11 = vadd.f32 %v1532_v6, %v1465_v9 }
 0xdf1   :  { %v1470_v14 = vadd.f32 %v1532_v6, %v1464_v10 }
 0xdf2   :  { %1473 = vst.msk [vmem:[#allocation2 + $0x8] sm:$0xff] %vm43_vm0, %v1471_v11 }
 0xdf3   :  { %1482 = vst.msk [vmem:[#allocation2 + $0x8] sm:$0xff] %vm1480_vm14, %v1477_v13 }
 0xdf4   :  { %1472 = vst.msk [vmem:[#allocation2] sm:$0xff] %vm43_vm0, %v1470_v14 }
 0xdf5   :  { %1481 = vst.msk [vmem:[#allocation2] sm:$0xff] %vm1480_vm14, %v1475_v15 }
 0xdf6   :  { %1869 = shalt.err (!%p1866_p4)
}
 0xdf7   :  { %s1870_s30 = scalar_lea.hbm %s2227_s5, 256 }
 0xdf8   :  { %p1871_p5 = scmp.ne.s32.totalorder %s2227_s5, %s1870_s30  ;;  %p1874_p6 = scmp.lt.u32.totalorder %s1870_s30, %s2227_s5 }
 0xdfa   :  { %p1876_p7 = pnand %p1874_p6, %p1871_p5 }
 0xdfc   :  { %1879 = shalt.err (!%p1876_p7)
}
 0xdfd   :  { %s1892_s9 = smov 128   ;;  %s1893_s10 = smov 8  }
 0xdfe   :  { %1494 = dma.vmem_to_hbm [thread:$0]  %s1489_s27, 256, %s2227_s5, [#allocation3], %s1892_s9, %s1892_s9, %s1893_s10  }
 0xdff   :  { %1880 = dma.done.wait [#allocation3], 256  }
 0xe00   :  { %1881 = vsyncadd [#allocation3], 4294967040 }
 0xe01   :  { %1498 = vsyncpa [#allocation3], 1 }

</bundles_post_ra>
